<compile_context>
chip_gen: v6e
topology: v6e:2x2x1
jax: 0.10.0
libtpu: 0.0.40
codegen_flags: <defaults>
</compile_context>

<pallas_src>
import functools
import math

import jax
import jax.numpy as jnp
from jax.experimental import pallas as pl
from jax.experimental.pallas import tpu as pltpu


# ----------------------------- fused Pallas kernel ------------------------------

def _fused_forward_kernel(x_ref, g_ref, cos_ref, sin_ref,
                          wp_ref, bp_ref, wo_ref, bo_ref,
                          w1_ref, b1_ref, wgv_ref, bgv_ref,
                          wl_ref, bl_ref,
                          out_ref, attn_ref,
                          *, H, Dh, causal, eps):
    """Entire SimpleModel forward for one batch element ((S, D) slab)."""
    D = H * Dh
    x = x_ref[0].astype(jnp.float32)              # (S, D) embeddings
    S = x.shape[0]
    g = g_ref[...]                                # (1, D) shared RMSNorm scale

    # ---- RMSNorm #1 (f32 elementwise) ----
    ms = jnp.mean(x * x, axis=-1, keepdims=True)
    x1 = x * jax.lax.rsqrt(ms + eps) * g          # (S, D)

    # ---- fused Q | Q_rot | K | K_rot | V projection (one MXU matmul) ----
    # rotate-half (and the 1/sqrt(Dh) scale on Q) were folded into the weight
    # columns at init time, so no lane shuffles are needed for RoPE here.
    proj = (jnp.dot(x1.astype(jnp.bfloat16), wp_ref[...],
                    preferred_element_type=jnp.float32) + bp_ref[...])   # (S, 5D)

    cos = cos_ref[...]                            # (S, D), per-head tiled
    sin = sin_ref[...]
    q, qrot = proj[:, 0 * D:1 * D], proj[:, 1 * D:2 * D]
    k, krot = proj[:, 2 * D:3 * D], proj[:, 3 * D:4 * D]
    v = proj[:, 4 * D:5 * D]

    q_rope = (q * cos + qrot * sin).astype(jnp.bfloat16)   # scale pre-folded
    k_rope = (k * cos + krot * sin).astype(jnp.bfloat16)
    v_b = v.astype(jnp.bfloat16)

    row = jax.lax.broadcasted_iota(jnp.int32, (S, S), 0)
    col = jax.lax.broadcasted_iota(jnp.int32, (S, S), 1)
    causal_mask = col <= row
    qk_dims = (((1,), (1,)), ((), ()))            # contract last dims (q @ k^T)

    # TODO(synk): for large S convert to a flash-style kv-tiled online softmax;
    # S=8 fits a single block here.
    for h in range(H):                            # static unroll, heads stay lane-packed
        sl = slice(h * Dh, (h + 1) * Dh)
        s = jax.lax.dot_general(q_rope[:, sl], k_rope[:, sl], qk_dims,
                                preferred_element_type=jnp.float32)      # (S, S)
        if causal:
            s = jnp.where(causal_mask, s, -1e30)  # finite mask: no inf-inf NaN risk
        m = jnp.max(s, axis=-1, keepdims=True)
        p = jnp.exp(s - m)
        p = p * pl.reciprocal(jnp.sum(p, axis=-1, keepdims=True), approx=True)
        # per-head result written to a VMEM scratch slab (no concatenate)
        attn_ref[:, sl] = jnp.dot(p.astype(jnp.bfloat16), v_b[:, sl],
                                  preferred_element_type=jnp.float32)

    # ---- attention out-projection + residual:  x2 = x1 + attn @ Wo + bo ----
    x2 = x1 + (jnp.dot(attn_ref[...].astype(jnp.bfloat16), wo_ref[...],
                       preferred_element_type=jnp.float32) + bo_ref[...])

    # ---- RMSNorm #2 (shared scale) ----
    ms2 = jnp.mean(x2 * x2, axis=-1, keepdims=True)
    x3 = x2 * jax.lax.rsqrt(ms2 + eps) * g

    # ---- Linear -> SwiGLU -> residual:  x4 = x3 + SiLU(gate) * val ----
    hmid = (jnp.dot(x3.astype(jnp.bfloat16), w1_ref[...],
                    preferred_element_type=jnp.float32) + b1_ref[...])   # (S, D)
    gv = (jnp.dot(hmid.astype(jnp.bfloat16), wgv_ref[...],
                  preferred_element_type=jnp.float32) + bgv_ref[...])    # (S, 2D)
    gate = gv[:, :D]
    val = gv[:, D:]
    x4 = x3 + gate * (1.0 / (1.0 + jnp.exp(-gate))) * val

    # ---- final linear into a lane-dense 128-wide padded logit slab ----
    out_ref[0] = (jnp.dot(x4.astype(jnp.bfloat16), wl_ref[...],
                          preferred_element_type=jnp.float32) + bl_ref[...])


def fused_forward(emb, prep, *, S, D, H, Dh, Np, causal, eps):
    B = emb.shape[0]
    const2 = lambda b: (0, 0)
    return pl.pallas_call(
        functools.partial(_fused_forward_kernel, H=H, Dh=Dh, causal=causal, eps=eps),
        out_shape=jax.ShapeDtypeStruct((B, S, Np), jnp.float32),
        grid=(B,),
        in_specs=[
            pl.BlockSpec((1, S, D), lambda b: (b, 0, 0)),   # embeddings
            pl.BlockSpec((1, D), const2),                    # rms scale
            pl.BlockSpec((S, D), const2),                    # cos (first S rows)
            pl.BlockSpec((S, D), const2),                    # sin
            pl.BlockSpec((D, 5 * D), const2),                # W_[q|q_rot|k|k_rot|v] bf16
            pl.BlockSpec((1, 5 * D), const2),                # matching bias
            pl.BlockSpec((D, D), const2),                    # Wo bf16
            pl.BlockSpec((1, D), const2),                    # bo
            pl.BlockSpec((D, D), const2),                    # W1 bf16
            pl.BlockSpec((1, D), const2),                    # b1
            pl.BlockSpec((D, 2 * D), const2),                # W_[gate|val] bf16
            pl.BlockSpec((1, 2 * D), const2),                # b_[gate|val]
            pl.BlockSpec((D, Np), const2),                   # W_last (lane-padded) bf16
            pl.BlockSpec((1, Np), const2),                   # b_last (lane-padded)
        ],
        out_specs=pl.BlockSpec((1, S, Np), lambda b: (b, 0, 0)),
        scratch_shapes=[pltpu.VMEM((S, D), jnp.float32)],    # per-head attn slab
        compiler_params=pltpu.CompilerParams(dimension_semantics=("parallel",)),
    )(emb, prep["g"], prep["cos"], prep["sin"],
      prep["w_proj"], prep["b_proj"], prep["wo"], prep["bo"],
      prep["w1"], prep["b1"], prep["wgv"], prep["bgv"],
      prep["wl"], prep["bl"])


# ----------------------------- parameter preparation (hoisted, run once) ----------

def make_rope_tables(max_seq_len, Dh, H):
    half = Dh // 2
    inv_freq = 1.0 / (10000.0 ** (jnp.arange(half, dtype=jnp.float32) / half))
    pos = jnp.arange(max_seq_len, dtype=jnp.float32)[:, None]     # (S, 1)
    angles = pos * inv_freq[None, :]                              # (S, half)
    cos = jnp.concatenate([jnp.cos(angles), jnp.cos(angles)], axis=-1)   # (S, Dh)
    sin = jnp.concatenate([jnp.sin(angles), jnp.sin(angles)], axis=-1)
    # tile per head so RoPE applies to the full lane-packed (S, D) slab
    return jnp.tile(cos, (1, H)), jnp.tile(sin, (1, H))           # (S, D)


def rotate_half_matrix(H, Dh):
    """Block-diagonal matrix R with q @ R == rotate_half(q) per head."""
    half = Dh // 2
    idx = jnp.arange(half)
    blk = jnp.zeros((Dh, Dh), jnp.float32)
    blk = blk.at[idx + half, idx].set(-1.0)   # out[j<half]  = -in[j+half]
    blk = blk.at[idx, idx + half].set(1.0)    # out[j>=half] =  in[j-half]
    return jnp.kron(jnp.eye(H, dtype=jnp.float32), blk)           # (D, D)


def prepare_params(params, config):
    """One-time: bf16 casts, QKV/gate-val concatenation, RoPE folding, lane padding."""
    D = config["hidden_size"]
    H = config["n_heads"]
    Dh = D // H
    O = config["output_size"]
    Np = ((O + 127) // 128) * 128
    scale = 1.0 / math.sqrt(Dh)

    R = rotate_half_matrix(H, Dh)
    cos, sin = make_rope_tables(config["max_seq_len"], Dh, H)

    wq = params["wq"] * scale                    # fold 1/sqrt(Dh) into the Q projection
    bq = params["bq"] * scale
    w_proj = jnp.concatenate(
        [wq, wq @ R, params["wk"], params["wk"] @ R, params["wv"]], axis=1)   # (D, 5D)
    b_proj = jnp.concatenate(
        [bq, bq @ R, params["bk"], params["bk"] @ R, params["bv"]], axis=0)   # (5D,)

    wgv = jnp.concatenate([params["wg"], params["wv2"]], axis=1)              # (D, 2D)
    bgv = jnp.concatenate([params["bg"], params["bv2"]], axis=0)

    wl_pad = jnp.zeros((D, Np), jnp.float32).at[:, :O].set(params["wl"])
    bl_pad = jnp.zeros((Np,), jnp.float32).at[:O].set(params["bl"])

    return {
        "embedding": params["embedding"],
        "g": params["rms_scale"].reshape(1, D),
        "cos": cos, "sin": sin,
        "w_proj": w_proj.astype(jnp.bfloat16), "b_proj": b_proj.reshape(1, 5 * D),
        "wo": params["wo"].astype(jnp.bfloat16), "bo": params["bo"].reshape(1, D),
        "w1": params["w1"].astype(jnp.bfloat16), "b1": params["b1"].reshape(1, D),
        "wgv": wgv.astype(jnp.bfloat16), "bgv": bgv.reshape(1, 2 * D),
        "wl": wl_pad.astype(jnp.bfloat16), "bl": bl_pad.reshape(1, Np),
    }


# ----------------------------- model glue ------------------------------

def init_params(key, config):
    V, D = config["vocab_size"], config["hidden_size"]
    O = config["output_size"]
    ks = jax.random.split(key, 16)

    def w(k, shape, s=0.02):
        return jax.random.normal(k, shape, dtype=jnp.float32) * s

    return {
        "embedding": w(ks[0], (V, D), 1.0),
        "rms_scale": jnp.ones((D,), jnp.float32),
        "wq": w(ks[1], (D, D)), "bq": jnp.zeros((D,), jnp.float32),
        "wk": w(ks[2], (D, D)), "bk": jnp.zeros((D,), jnp.float32),
        "wv": w(ks[3], (D, D)), "bv": jnp.zeros((D,), jnp.float32),
        "wo": w(ks[4], (D, D)), "bo": jnp.zeros((D,), jnp.float32),
        "w1": w(ks[5], (D, D)), "b1": w(ks[6], (D,)),
        "wg": w(ks[7], (D, D)), "bg": w(ks[8], (D,)),
        "wv2": w(ks[9], (D, D)), "bv2": w(ks[10], (D,)),
        "wl": w(ks[11], (D, O)), "bl": jnp.zeros((O,), jnp.float32),
    }


def simple_model_forward(tokens, prep, config):
    B, S = tokens.shape
    D = config["hidden_size"]
    H = config["n_heads"]
    Dh = D // H
    O = config["output_size"]
    Np = prep["wl"].shape[1]

    # TODO(synk): data-dependent embedding gather stays in plain JAX (a manual-DMA
    # gather kernel is not warranted at these sizes).
    emb = jnp.take(prep["embedding"], tokens, axis=0)             # (B, S, D)

    logits_pad = fused_forward(emb, prep, S=S, D=D, H=H, Dh=Dh, Np=Np,
                               causal=config["causal"], eps=1e-8)
    return logits_pad[:, :, :O]                                   # (B, S, O)


if __name__ == "__main__":
    config = dict(vocab_size=64, hidden_size=32, max_seq_len=16,
                  n_heads=4, causal=True, output_size=16)

    key = jax.random.PRNGKey(0)
    pkey, tkey = jax.random.split(key)
    params = init_params(pkey, config)
    prep = prepare_params(params, config)        # hoisted: runs once, not per forward

    B, S = 2, 8
    tokens = jax.random.randint(tkey, (B, S), 0, config["vocab_size"], dtype=jnp.int32)

    fwd = jax.jit(functools.partial(simple_model_forward, config=config))
    logits = fwd(tokens, prep)
    logits = jax.block_until_ready(logits)
    assert logits.shape == (B, S, config["output_size"])
    assert bool(jnp.all(jnp.isfinite(logits)))
    print("KERNEL_OK")
</pallas_src>

<mosaic_0001>
module attributes {stable_mosaic.version = 11 : i64} {
  func.func @_fused_forward_kernel(%arg0: i32, %arg1: memref<1x8x32xf32, #tpu.memory_space<vmem>>, %arg2: memref<1x32xf32, #tpu.memory_space<vmem>>, %arg3: memref<8x32xf32, #tpu.memory_space<vmem>>, %arg4: memref<8x32xf32, #tpu.memory_space<vmem>>, %arg5: memref<32x160xbf16, #tpu.memory_space<vmem>>, %arg6: memref<1x160xf32, #tpu.memory_space<vmem>>, %arg7: memref<32x32xbf16, #tpu.memory_space<vmem>>, %arg8: memref<1x32xf32, #tpu.memory_space<vmem>>, %arg9: memref<32x32xbf16, #tpu.memory_space<vmem>>, %arg10: memref<1x32xf32, #tpu.memory_space<vmem>>, %arg11: memref<32x64xbf16, #tpu.memory_space<vmem>>, %arg12: memref<1x64xf32, #tpu.memory_space<vmem>>, %arg13: memref<32x128xbf16, #tpu.memory_space<vmem>>, %arg14: memref<1x128xf32, #tpu.memory_space<vmem>>, %arg15: memref<1x8x128xf32, #tpu.memory_space<vmem>>, %arg16: memref<8x32xf32, #tpu.memory_space<vmem>>) attributes {dimension_semantics = [#tpu.dimension_semantics<parallel>], iteration_bounds = array<i64: 2>, scalar_prefetch = 0 : i64, scratch_operands = 1 : i64, tpu.core_type = #tpu.core_type<tc>, window_params = [{transform_indices = @transform_0, window_bounds = array<i64: 1, 8, 32>}, {pipeline_mode = #tpu.pipeline_mode<synchronous>, transform_indices = @transform_1, window_bounds = array<i64: 1, 32>}, {transform_indices = @transform_2, window_bounds = array<i64: 8, 32>}, {transform_indices = @transform_3, window_bounds = array<i64: 8, 32>}, {pipeline_mode = #tpu.pipeline_mode<synchronous>, transform_indices = @transform_4, window_bounds = array<i64: 32, 160>}, {pipeline_mode = #tpu.pipeline_mode<synchronous>, transform_indices = @transform_5, window_bounds = array<i64: 1, 160>}, {pipeline_mode = #tpu.pipeline_mode<synchronous>, transform_indices = @transform_6, window_bounds = array<i64: 32, 32>}, {pipeline_mode = #tpu.pipeline_mode<synchronous>, transform_indices = @transform_7, window_bounds = array<i64: 1, 32>}, {pipeline_mode = #tpu.pipeline_mode<synchronous>, transform_indices = @transform_8, window_bounds = array<i64: 32, 32>}, {pipeline_mode = #tpu.pipeline_mode<synchronous>, transform_indices = @transform_9, window_bounds = array<i64: 1, 32>}, {pipeline_mode = #tpu.pipeline_mode<synchronous>, transform_indices = @transform_10, window_bounds = array<i64: 32, 64>}, {pipeline_mode = #tpu.pipeline_mode<synchronous>, transform_indices = @transform_11, window_bounds = array<i64: 1, 64>}, {pipeline_mode = #tpu.pipeline_mode<synchronous>, transform_indices = @transform_12, window_bounds = array<i64: 32, 128>}, {pipeline_mode = #tpu.pipeline_mode<synchronous>, transform_indices = @transform_13, window_bounds = array<i64: 1, 128>}, {transform_indices = @transform_14, window_bounds = array<i64: 1, 8, 128>}]} {
    %c0 = arith.constant 0 : index
    %c0_0 = arith.constant 0 : index
    %c0_1 = arith.constant 0 : index
    %0 = vector.load %arg1[%c0, %c0_0, %c0_1] : memref<1x8x32xf32, #tpu.memory_space<vmem>>, vector<1x8x32xf32>
    %1 = vector.shape_cast %0 : vector<1x8x32xf32> to vector<8x32xf32>
    %c0_2 = arith.constant 0 : index
    %c0_3 = arith.constant 0 : index
    %2 = vector.load %arg2[%c0_2, %c0_3] : memref<1x32xf32, #tpu.memory_space<vmem>>, vector<1x32xf32>
    %3 = arith.mulf %1, %1 : vector<8x32xf32>
    %cst = arith.constant dense<0.000000e+00> : vector<8xf32>
    %4 = vector.multi_reduction <add>, %3, %cst [1] : vector<8x32xf32> to vector<8xf32>
    %5 = vector.shape_cast %4 : vector<8xf32> to vector<8x1xf32>
    %cst_4 = arith.constant 3.200000e+01 : f32
    %6 = vector.broadcast %cst_4 : f32 to vector<8x1xf32>
    %7 = arith.divf %5, %6 : vector<8x1xf32>
    %cst_5 = arith.constant 9.99999993E-9 : f32
    %8 = vector.broadcast %cst_5 : f32 to vector<8x1xf32>
    %9 = arith.addf %7, %8 : vector<8x1xf32>
    %10 = math.rsqrt %9 : vector<8x1xf32>
    %11 = vector.broadcast %10 : vector<8x1xf32> to vector<8x32xf32>
    %12 = arith.mulf %1, %11 : vector<8x32xf32>
    %13 = vector.broadcast %2 : vector<1x32xf32> to vector<8x32xf32>
    %14 = arith.mulf %12, %13 : vector<8x32xf32>
    %15 = arith.truncf %14 : vector<8x32xf32> to vector<8x32xbf16>
    %c0_6 = arith.constant 0 : index
    %c0_7 = arith.constant 0 : index
    %16 = vector.load %arg5[%c0_6, %c0_7] : memref<32x160xbf16, #tpu.memory_space<vmem>>, vector<32x160xbf16>
    %cst_8 = arith.constant dense<0.000000e+00> : vector<8x160xf32>
    %17 = tpu.matmul %15, %16, %cst_8 {dimension_numbers = #tpu.dot_dimension_numbers<[1], [0], [0], [1], [0, 0, 1, 1], [], []>} : vector<8x32xbf16>, vector<32x160xbf16>, vector<8x160xf32> -> vector<8x160xf32>
    %c0_9 = arith.constant 0 : index
    %c0_10 = arith.constant 0 : index
    %18 = vector.load %arg6[%c0_9, %c0_10] : memref<1x160xf32, #tpu.memory_space<vmem>>, vector<1x160xf32>
    %19 = vector.broadcast %18 : vector<1x160xf32> to vector<8x160xf32>
    %20 = arith.addf %17, %19 : vector<8x160xf32>
    %c0_11 = arith.constant 0 : index
    %c0_12 = arith.constant 0 : index
    %21 = vector.load %arg3[%c0_11, %c0_12] : memref<8x32xf32, #tpu.memory_space<vmem>>, vector<8x32xf32>
    %c0_13 = arith.constant 0 : index
    %c0_14 = arith.constant 0 : index
    %22 = vector.load %arg4[%c0_13, %c0_14] : memref<8x32xf32, #tpu.memory_space<vmem>>, vector<8x32xf32>
    %23 = vector.extract_strided_slice %20 {offsets = [0, 0], sizes = [8, 32], strides = [1, 1]} : vector<8x160xf32> to vector<8x32xf32>
    %24 = vector.extract_strided_slice %20 {offsets = [0, 32], sizes = [8, 32], strides = [1, 1]} : vector<8x160xf32> to vector<8x32xf32>
    %25 = vector.extract_strided_slice %20 {offsets = [0, 64], sizes = [8, 32], strides = [1, 1]} : vector<8x160xf32> to vector<8x32xf32>
    %26 = vector.extract_strided_slice %20 {offsets = [0, 96], sizes = [8, 32], strides = [1, 1]} : vector<8x160xf32> to vector<8x32xf32>
    %27 = vector.extract_strided_slice %20 {offsets = [0, 128], sizes = [8, 32], strides = [1, 1]} : vector<8x160xf32> to vector<8x32xf32>
    %28 = arith.mulf %23, %21 : vector<8x32xf32>
    %29 = arith.mulf %24, %22 : vector<8x32xf32>
    %30 = arith.addf %28, %29 : vector<8x32xf32>
    %31 = arith.truncf %30 : vector<8x32xf32> to vector<8x32xbf16>
    %32 = arith.mulf %25, %21 : vector<8x32xf32>
    %33 = arith.mulf %26, %22 : vector<8x32xf32>
    %34 = arith.addf %32, %33 : vector<8x32xf32>
    %35 = arith.truncf %34 : vector<8x32xf32> to vector<8x32xbf16>
    %36 = arith.truncf %27 : vector<8x32xf32> to vector<8x32xbf16>
    %37 = tpu.iota {dimensions = array<i32: 0>} : vector<8x8xi32>
    %38 = tpu.iota {dimensions = array<i32: 1>} : vector<8x8xi32>
    %39 = arith.cmpi sle, %38, %37 : vector<8x8xi32>
    %40 = vector.extract_strided_slice %31 {offsets = [0, 0], sizes = [8, 8], strides = [1, 1]} : vector<8x32xbf16> to vector<8x8xbf16>
    %41 = vector.extract_strided_slice %35 {offsets = [0, 0], sizes = [8, 8], strides = [1, 1]} : vector<8x32xbf16> to vector<8x8xbf16>
    %cst_15 = arith.constant dense<0.000000e+00> : vector<8x8xf32>
    %42 = tpu.matmul %40, %41, %cst_15 {dimension_numbers = #tpu.dot_dimension_numbers<[1], [1], [0], [0], [0, 0, 1, 0], [], []>} : vector<8x8xbf16>, vector<8x8xbf16>, vector<8x8xf32> -> vector<8x8xf32>
    %cst_16 = arith.constant -1.000000e+30 : f32
    %43 = vector.broadcast %cst_16 : f32 to vector<8x8xf32>
    %44 = arith.select %39, %42, %43 : vector<8x8xi1>, vector<8x8xf32>
    %cst_17 = arith.constant dense<0xFF800000> : vector<8xf32>
    %45 = vector.multi_reduction <maximumf>, %44, %cst_17 [1] : vector<8x8xf32> to vector<8xf32>
    %46 = vector.shape_cast %45 : vector<8xf32> to vector<8x1xf32>
    %47 = vector.broadcast %46 : vector<8x1xf32> to vector<8x8xf32>
    %48 = arith.subf %44, %47 : vector<8x8xf32>
    %49 = math.exp %48 : vector<8x8xf32>
    %cst_18 = arith.constant dense<0.000000e+00> : vector<8xf32>
    %50 = vector.multi_reduction <add>, %49, %cst_18 [1] : vector<8x8xf32> to vector<8xf32>
    %51 = vector.shape_cast %50 : vector<8xf32> to vector<8x1xf32>
    %52 = tpu.reciprocal %51 {approx = true} : vector<8x1xf32> -> vector<8x1xf32>
    %53 = vector.broadcast %52 : vector<8x1xf32> to vector<8x8xf32>
    %54 = arith.mulf %49, %53 : vector<8x8xf32>
    %55 = arith.truncf %54 : vector<8x8xf32> to vector<8x8xbf16>
    %56 = vector.extract_strided_slice %36 {offsets = [0, 0], sizes = [8, 8], strides = [1, 1]} : vector<8x32xbf16> to vector<8x8xbf16>
    %cst_19 = arith.constant dense<0.000000e+00> : vector<8x8xf32>
    %57 = tpu.matmul %55, %56, %cst_19 {dimension_numbers = #tpu.dot_dimension_numbers<[1], [0], [0], [1], [0, 0, 1, 1], [], []>} : vector<8x8xbf16>, vector<8x8xbf16>, vector<8x8xf32> -> vector<8x8xf32>
    %c0_20 = arith.constant 0 : index
    %c0_21 = arith.constant 0 : index
    %58 = vector.load %arg16[%c0_20, %c0_21] : memref<8x32xf32, #tpu.memory_space<vmem>>, vector<8x8xf32>
    tpu.vector_store %arg16[%c0_20, %c0_21], %57 {strides = array<i32>} : memref<8x32xf32, #tpu.memory_space<vmem>>, vector<8x8xf32>,
    %59 = vector.extract_strided_slice %31 {offsets = [0, 8], sizes = [8, 8], strides = [1, 1]} : vector<8x32xbf16> to vector<8x8xbf16>
    %60 = vector.extract_strided_slice %35 {offsets = [0, 8], sizes = [8, 8], strides = [1, 1]} : vector<8x32xbf16> to vector<8x8xbf16>
    %cst_22 = arith.constant dense<0.000000e+00> : vector<8x8xf32>
    %61 = tpu.matmul %59, %60, %cst_22 {dimension_numbers = #tpu.dot_dimension_numbers<[1], [1], [0], [0], [0, 0, 1, 0], [], []>} : vector<8x8xbf16>, vector<8x8xbf16>, vector<8x8xf32> -> vector<8x8xf32>
    %cst_23 = arith.constant -1.000000e+30 : f32
    %62 = vector.broadcast %cst_23 : f32 to vector<8x8xf32>
    %63 = arith.select %39, %61, %62 : vector<8x8xi1>, vector<8x8xf32>
    %cst_24 = arith.constant dense<0xFF800000> : vector<8xf32>
    %64 = vector.multi_reduction <maximumf>, %63, %cst_24 [1] : vector<8x8xf32> to vector<8xf32>
    %65 = vector.shape_cast %64 : vector<8xf32> to vector<8x1xf32>
    %66 = vector.broadcast %65 : vector<8x1xf32> to vector<8x8xf32>
    %67 = arith.subf %63, %66 : vector<8x8xf32>
    %68 = math.exp %67 : vector<8x8xf32>
    %cst_25 = arith.constant dense<0.000000e+00> : vector<8xf32>
    %69 = vector.multi_reduction <add>, %68, %cst_25 [1] : vector<8x8xf32> to vector<8xf32>
    %70 = vector.shape_cast %69 : vector<8xf32> to vector<8x1xf32>
    %71 = tpu.reciprocal %70 {approx = true} : vector<8x1xf32> -> vector<8x1xf32>
    %72 = vector.broadcast %71 : vector<8x1xf32> to vector<8x8xf32>
    %73 = arith.mulf %68, %72 : vector<8x8xf32>
    %74 = arith.truncf %73 : vector<8x8xf32> to vector<8x8xbf16>
    %75 = vector.extract_strided_slice %36 {offsets = [0, 8], sizes = [8, 8], strides = [1, 1]} : vector<8x32xbf16> to vector<8x8xbf16>
    %cst_26 = arith.constant dense<0.000000e+00> : vector<8x8xf32>
    %76 = tpu.matmul %74, %75, %cst_26 {dimension_numbers = #tpu.dot_dimension_numbers<[1], [0], [0], [1], [0, 0, 1, 1], [], []>} : vector<8x8xbf16>, vector<8x8xbf16>, vector<8x8xf32> -> vector<8x8xf32>
    %c0_27 = arith.constant 0 : index
    %c8 = arith.constant 8 : index
    %77 = vector.load %arg16[%c0_27, %c8] : memref<8x32xf32, #tpu.memory_space<vmem>>, vector<8x8xf32>
    tpu.vector_store %arg16[%c0_27, %c8], %76 {strides = array<i32>} : memref<8x32xf32, #tpu.memory_space<vmem>>, vector<8x8xf32>,
    %78 = vector.extract_strided_slice %31 {offsets = [0, 16], sizes = [8, 8], strides = [1, 1]} : vector<8x32xbf16> to vector<8x8xbf16>
    %79 = vector.extract_strided_slice %35 {offsets = [0, 16], sizes = [8, 8], strides = [1, 1]} : vector<8x32xbf16> to vector<8x8xbf16>
    %cst_28 = arith.constant dense<0.000000e+00> : vector<8x8xf32>
    %80 = tpu.matmul %78, %79, %cst_28 {dimension_numbers = #tpu.dot_dimension_numbers<[1], [1], [0], [0], [0, 0, 1, 0], [], []>} : vector<8x8xbf16>, vector<8x8xbf16>, vector<8x8xf32> -> vector<8x8xf32>
    %cst_29 = arith.constant -1.000000e+30 : f32
    %81 = vector.broadcast %cst_29 : f32 to vector<8x8xf32>
    %82 = arith.select %39, %80, %81 : vector<8x8xi1>, vector<8x8xf32>
    %cst_30 = arith.constant dense<0xFF800000> : vector<8xf32>
    %83 = vector.multi_reduction <maximumf>, %82, %cst_30 [1] : vector<8x8xf32> to vector<8xf32>
    %84 = vector.shape_cast %83 : vector<8xf32> to vector<8x1xf32>
    %85 = vector.broadcast %84 : vector<8x1xf32> to vector<8x8xf32>
    %86 = arith.subf %82, %85 : vector<8x8xf32>
    %87 = math.exp %86 : vector<8x8xf32>
    %cst_31 = arith.constant dense<0.000000e+00> : vector<8xf32>
    %88 = vector.multi_reduction <add>, %87, %cst_31 [1] : vector<8x8xf32> to vector<8xf32>
    %89 = vector.shape_cast %88 : vector<8xf32> to vector<8x1xf32>
    %90 = tpu.reciprocal %89 {approx = true} : vector<8x1xf32> -> vector<8x1xf32>
    %91 = vector.broadcast %90 : vector<8x1xf32> to vector<8x8xf32>
    %92 = arith.mulf %87, %91 : vector<8x8xf32>
    %93 = arith.truncf %92 : vector<8x8xf32> to vector<8x8xbf16>
    %94 = vector.extract_strided_slice %36 {offsets = [0, 16], sizes = [8, 8], strides = [1, 1]} : vector<8x32xbf16> to vector<8x8xbf16>
    %cst_32 = arith.constant dense<0.000000e+00> : vector<8x8xf32>
    %95 = tpu.matmul %93, %94, %cst_32 {dimension_numbers = #tpu.dot_dimension_numbers<[1], [0], [0], [1], [0, 0, 1, 1], [], []>} : vector<8x8xbf16>, vector<8x8xbf16>, vector<8x8xf32> -> vector<8x8xf32>
    %c0_33 = arith.constant 0 : index
    %c16 = arith.constant 16 : index
    %96 = vector.load %arg16[%c0_33, %c16] : memref<8x32xf32, #tpu.memory_space<vmem>>, vector<8x8xf32>
    tpu.vector_store %arg16[%c0_33, %c16], %95 {strides = array<i32>} : memref<8x32xf32, #tpu.memory_space<vmem>>, vector<8x8xf32>,
    %97 = vector.extract_strided_slice %31 {offsets = [0, 24], sizes = [8, 8], strides = [1, 1]} : vector<8x32xbf16> to vector<8x8xbf16>
    %98 = vector.extract_strided_slice %35 {offsets = [0, 24], sizes = [8, 8], strides = [1, 1]} : vector<8x32xbf16> to vector<8x8xbf16>
    %cst_34 = arith.constant dense<0.000000e+00> : vector<8x8xf32>
    %99 = tpu.matmul %97, %98, %cst_34 {dimension_numbers = #tpu.dot_dimension_numbers<[1], [1], [0], [0], [0, 0, 1, 0], [], []>} : vector<8x8xbf16>, vector<8x8xbf16>, vector<8x8xf32> -> vector<8x8xf32>
    %cst_35 = arith.constant -1.000000e+30 : f32
    %100 = vector.broadcast %cst_35 : f32 to vector<8x8xf32>
    %101 = arith.select %39, %99, %100 : vector<8x8xi1>, vector<8x8xf32>
    %cst_36 = arith.constant dense<0xFF800000> : vector<8xf32>
    %102 = vector.multi_reduction <maximumf>, %101, %cst_36 [1] : vector<8x8xf32> to vector<8xf32>
    %103 = vector.shape_cast %102 : vector<8xf32> to vector<8x1xf32>
    %104 = vector.broadcast %103 : vector<8x1xf32> to vector<8x8xf32>
    %105 = arith.subf %101, %104 : vector<8x8xf32>
    %106 = math.exp %105 : vector<8x8xf32>
    %cst_37 = arith.constant dense<0.000000e+00> : vector<8xf32>
    %107 = vector.multi_reduction <add>, %106, %cst_37 [1] : vector<8x8xf32> to vector<8xf32>
    %108 = vector.shape_cast %107 : vector<8xf32> to vector<8x1xf32>
    %109 = tpu.reciprocal %108 {approx = true} : vector<8x1xf32> -> vector<8x1xf32>
    %110 = vector.broadcast %109 : vector<8x1xf32> to vector<8x8xf32>
    %111 = arith.mulf %106, %110 : vector<8x8xf32>
    %112 = arith.truncf %111 : vector<8x8xf32> to vector<8x8xbf16>
    %113 = vector.extract_strided_slice %36 {offsets = [0, 24], sizes = [8, 8], strides = [1, 1]} : vector<8x32xbf16> to vector<8x8xbf16>
    %cst_38 = arith.constant dense<0.000000e+00> : vector<8x8xf32>
    %114 = tpu.matmul %112, %113, %cst_38 {dimension_numbers = #tpu.dot_dimension_numbers<[1], [0], [0], [1], [0, 0, 1, 1], [], []>} : vector<8x8xbf16>, vector<8x8xbf16>, vector<8x8xf32> -> vector<8x8xf32>
    %c0_39 = arith.constant 0 : index
    %c24 = arith.constant 24 : index
    %115 = vector.load %arg16[%c0_39, %c24] : memref<8x32xf32, #tpu.memory_space<vmem>>, vector<8x8xf32>
    tpu.vector_store %arg16[%c0_39, %c24], %114 {strides = array<i32>} : memref<8x32xf32, #tpu.memory_space<vmem>>, vector<8x8xf32>,
    %c0_40 = arith.constant 0 : index
    %c0_41 = arith.constant 0 : index
    %116 = vector.load %arg16[%c0_40, %c0_41] : memref<8x32xf32, #tpu.memory_space<vmem>>, vector<8x32xf32>
    %117 = arith.truncf %116 : vector<8x32xf32> to vector<8x32xbf16>
    %c0_42 = arith.constant 0 : index
    %c0_43 = arith.constant 0 : index
    %118 = vector.load %arg7[%c0_42, %c0_43] : memref<32x32xbf16, #tpu.memory_space<vmem>>, vector<32x32xbf16>
    %cst_44 = arith.constant dense<0.000000e+00> : vector<8x32xf32>
    %119 = tpu.matmul %117, %118, %cst_44 {dimension_numbers = #tpu.dot_dimension_numbers<[1], [0], [0], [1], [0, 0, 1, 1], [], []>} : vector<8x32xbf16>, vector<32x32xbf16>, vector<8x32xf32> -> vector<8x32xf32>
    %c0_45 = arith.constant 0 : index
    %c0_46 = arith.constant 0 : index
    %120 = vector.load %arg8[%c0_45, %c0_46] : memref<1x32xf32, #tpu.memory_space<vmem>>, vector<1x32xf32>
    %121 = vector.broadcast %120 : vector<1x32xf32> to vector<8x32xf32>
    %122 = arith.addf %119, %121 : vector<8x32xf32>
    %123 = arith.addf %14, %122 : vector<8x32xf32>
    %124 = arith.mulf %123, %123 : vector<8x32xf32>
    %cst_47 = arith.constant dense<0.000000e+00> : vector<8xf32>
    %125 = vector.multi_reduction <add>, %124, %cst_47 [1] : vector<8x32xf32> to vector<8xf32>
    %126 = vector.shape_cast %125 : vector<8xf32> to vector<8x1xf32>
    %cst_48 = arith.constant 3.200000e+01 : f32
    %127 = vector.broadcast %cst_48 : f32 to vector<8x1xf32>
    %128 = arith.divf %126, %127 : vector<8x1xf32>
    %cst_49 = arith.constant 9.99999993E-9 : f32
    %129 = vector.broadcast %cst_49 : f32 to vector<8x1xf32>
    %130 = arith.addf %128, %129 : vector<8x1xf32>
    %131 = math.rsqrt %130 : vector<8x1xf32>
    %132 = vector.broadcast %131 : vector<8x1xf32> to vector<8x32xf32>
    %133 = arith.mulf %123, %132 : vector<8x32xf32>
    %134 = vector.broadcast %2 : vector<1x32xf32> to vector<8x32xf32>
    %135 = arith.mulf %133, %134 : vector<8x32xf32>
    %136 = arith.truncf %135 : vector<8x32xf32> to vector<8x32xbf16>
    %c0_50 = arith.constant 0 : index
    %c0_51 = arith.constant 0 : index
    %137 = vector.load %arg9[%c0_50, %c0_51] : memref<32x32xbf16, #tpu.memory_space<vmem>>, vector<32x32xbf16>
    %cst_52 = arith.constant dense<0.000000e+00> : vector<8x32xf32>
    %138 = tpu.matmul %136, %137, %cst_52 {dimension_numbers = #tpu.dot_dimension_numbers<[1], [0], [0], [1], [0, 0, 1, 1], [], []>} : vector<8x32xbf16>, vector<32x32xbf16>, vector<8x32xf32> -> vector<8x32xf32>
    %c0_53 = arith.constant 0 : index
    %c0_54 = arith.constant 0 : index
    %139 = vector.load %arg10[%c0_53, %c0_54] : memref<1x32xf32, #tpu.memory_space<vmem>>, vector<1x32xf32>
    %140 = vector.broadcast %139 : vector<1x32xf32> to vector<8x32xf32>
    %141 = arith.addf %138, %140 : vector<8x32xf32>
    %142 = arith.truncf %141 : vector<8x32xf32> to vector<8x32xbf16>
    %c0_55 = arith.constant 0 : index
    %c0_56 = arith.constant 0 : index
    %143 = vector.load %arg11[%c0_55, %c0_56] : memref<32x64xbf16, #tpu.memory_space<vmem>>, vector<32x64xbf16>
    %cst_57 = arith.constant dense<0.000000e+00> : vector<8x64xf32>
    %144 = tpu.matmul %142, %143, %cst_57 {dimension_numbers = #tpu.dot_dimension_numbers<[1], [0], [0], [1], [0, 0, 1, 1], [], []>} : vector<8x32xbf16>, vector<32x64xbf16>, vector<8x64xf32> -> vector<8x64xf32>
    %c0_58 = arith.constant 0 : index
    %c0_59 = arith.constant 0 : index
    %145 = vector.load %arg12[%c0_58, %c0_59] : memref<1x64xf32, #tpu.memory_space<vmem>>, vector<1x64xf32>
    %146 = vector.broadcast %145 : vector<1x64xf32> to vector<8x64xf32>
    %147 = arith.addf %144, %146 : vector<8x64xf32>
    %148 = vector.extract_strided_slice %147 {offsets = [0, 0], sizes = [8, 32], strides = [1, 1]} : vector<8x64xf32> to vector<8x32xf32>
    %149 = vector.extract_strided_slice %147 {offsets = [0, 32], sizes = [8, 32], strides = [1, 1]} : vector<8x64xf32> to vector<8x32xf32>
    %cst_60 = arith.constant 0.000000e+00 : f32
    %150 = vector.broadcast %cst_60 : f32 to vector<8x32xf32>
    %151 = arith.subf %150, %148 : vector<8x32xf32>
    %152 = math.exp %151 : vector<8x32xf32>
    %cst_61 = arith.constant 1.000000e+00 : f32
    %153 = vector.broadcast %cst_61 : f32 to vector<8x32xf32>
    %154 = arith.addf %153, %152 : vector<8x32xf32>
    %cst_62 = arith.constant 1.000000e+00 : f32
    %155 = vector.broadcast %cst_62 : f32 to vector<8x32xf32>
    %156 = arith.divf %155, %154 : vector<8x32xf32>
    %157 = arith.mulf %148, %156 : vector<8x32xf32>
    %158 = arith.mulf %157, %149 : vector<8x32xf32>
    %159 = arith.addf %135, %158 : vector<8x32xf32>
    %160 = arith.truncf %159 : vector<8x32xf32> to vector<8x32xbf16>
    %c0_63 = arith.constant 0 : index
    %c0_64 = arith.constant 0 : index
    %161 = vector.load %arg13[%c0_63, %c0_64] : memref<32x128xbf16, #tpu.memory_space<vmem>>, vector<32x128xbf16>
    %cst_65 = arith.constant dense<0.000000e+00> : vector<8x128xf32>
    %162 = tpu.matmul %160, %161, %cst_65 {dimension_numbers = #tpu.dot_dimension_numbers<[1], [0], [0], [1], [0, 0, 1, 1], [], []>} : vector<8x32xbf16>, vector<32x128xbf16>, vector<8x128xf32> -> vector<8x128xf32>
    %c0_66 = arith.constant 0 : index
    %c0_67 = arith.constant 0 : index
    %163 = vector.load %arg14[%c0_66, %c0_67] : memref<1x128xf32, #tpu.memory_space<vmem>>, vector<1x128xf32>
    %164 = vector.broadcast %163 : vector<1x128xf32> to vector<8x128xf32>
    %165 = arith.addf %162, %164 : vector<8x128xf32>
    %c0_68 = arith.constant 0 : index
    %c0_69 = arith.constant 0 : index
    %c0_70 = arith.constant 0 : index
    %166 = vector.load %arg15[%c0_68, %c0_69, %c0_70] : memref<1x8x128xf32, #tpu.memory_space<vmem>>, vector<1x8x128xf32>
    %167 = vector.shape_cast %166 : vector<1x8x128xf32> to vector<8x128xf32>
    %168 = vector.shape_cast %165 : vector<8x128xf32> to vector<1x8x128xf32>
    tpu.vector_store %arg15[%c0_68, %c0_69, %c0_70], %168 {strides = array<i32>} : memref<1x8x128xf32, #tpu.memory_space<vmem>>, vector<1x8x128xf32>,
    return
  }
  func.func @transform_0(%arg0: i32) -> (i32, i32, i32) {
    %c0_i32 = arith.constant 0 : i32
    %c0_i32_0 = arith.constant 0 : i32
    %c0_i32_1 = arith.constant 0 : i32
    return %arg0, %c0_i32, %c0_i32_0 : i32, i32, i32
  }
  func.func @transform_1(%arg0: i32) -> (i32, i32) {
    %c0_i32 = arith.constant 0 : i32
    %c0_i32_0 = arith.constant 0 : i32
    %c0_i32_1 = arith.constant 0 : i32
    return %c0_i32, %c0_i32_0 : i32, i32
  }
  func.func @transform_2(%arg0: i32) -> (i32, i32) {
    %c0_i32 = arith.constant 0 : i32
    %c0_i32_0 = arith.constant 0 : i32
    %c0_i32_1 = arith.constant 0 : i32
    return %c0_i32, %c0_i32_0 : i32, i32
  }
  func.func @transform_3(%arg0: i32) -> (i32, i32) {
    %c0_i32 = arith.constant 0 : i32
    %c0_i32_0 = arith.constant 0 : i32
    %c0_i32_1 = arith.constant 0 : i32
    return %c0_i32, %c0_i32_0 : i32, i32
  }
  func.func @transform_4(%arg0: i32) -> (i32, i32) {
    %c0_i32 = arith.constant 0 : i32
    %c0_i32_0 = arith.constant 0 : i32
    %c0_i32_1 = arith.constant 0 : i32
    return %c0_i32, %c0_i32_0 : i32, i32
  }
  func.func @transform_5(%arg0: i32) -> (i32, i32) {
    %c0_i32 = arith.constant 0 : i32
    %c0_i32_0 = arith.constant 0 : i32
    %c0_i32_1 = arith.constant 0 : i32
    return %c0_i32, %c0_i32_0 : i32, i32
  }
  func.func @transform_6(%arg0: i32) -> (i32, i32) {
    %c0_i32 = arith.constant 0 : i32
    %c0_i32_0 = arith.constant 0 : i32
    %c0_i32_1 = arith.constant 0 : i32
    return %c0_i32, %c0_i32_0 : i32, i32
  }
  func.func @transform_7(%arg0: i32) -> (i32, i32) {
    %c0_i32 = arith.constant 0 : i32
    %c0_i32_0 = arith.constant 0 : i32
    %c0_i32_1 = arith.constant 0 : i32
    return %c0_i32, %c0_i32_0 : i32, i32
  }
  func.func @transform_8(%arg0: i32) -> (i32, i32) {
    %c0_i32 = arith.constant 0 : i32
    %c0_i32_0 = arith.constant 0 : i32
    %c0_i32_1 = arith.constant 0 : i32
    return %c0_i32, %c0_i32_0 : i32, i32
  }
  func.func @transform_9(%arg0: i32) -> (i32, i32) {
    %c0_i32 = arith.constant 0 : i32
    %c0_i32_0 = arith.constant 0 : i32
    %c0_i32_1 = arith.constant 0 : i32
    return %c0_i32, %c0_i32_0 : i32, i32
  }
  func.func @transform_10(%arg0: i32) -> (i32, i32) {
    %c0_i32 = arith.constant 0 : i32
    %c0_i32_0 = arith.constant 0 : i32
    %c0_i32_1 = arith.constant 0 : i32
    return %c0_i32, %c0_i32_0 : i32, i32
  }
  func.func @transform_11(%arg0: i32) -> (i32, i32) {
    %c0_i32 = arith.constant 0 : i32
    %c0_i32_0 = arith.constant 0 : i32
    %c0_i32_1 = arith.constant 0 : i32
    return %c0_i32, %c0_i32_0 : i32, i32
  }
  func.func @transform_12(%arg0: i32) -> (i32, i32) {
    %c0_i32 = arith.constant 0 : i32
    %c0_i32_0 = arith.constant 0 : i32
    %c0_i32_1 = arith.constant 0 : i32
    return %c0_i32, %c0_i32_0 : i32, i32
  }
  func.func @transform_13(%arg0: i32) -> (i32, i32) {
    %c0_i32 = arith.constant 0 : i32
    %c0_i32_0 = arith.constant 0 : i32
    %c0_i32_1 = arith.constant 0 : i32
    return %c0_i32, %c0_i32_0 : i32, i32
  }
  func.func @transform_14(%arg0: i32) -> (i32, i32, i32) {
    %c0_i32 = arith.constant 0 : i32
    %c0_i32_0 = arith.constant 0 : i32
    %c0_i32_1 = arith.constant 0 : i32
    return %arg0, %c0_i32, %c0_i32_0 : i32, i32, i32
  }
}

</mosaic_0001>

<bundles_post_ra>
// kernel: simple_model_forward.1
= control target key start
LH: loop header
LB: loop body
LE: loop exit
PB: predicated region body
PF: predicated region fallthrough
CT: control target
= control target key end

     0   :  { %s2095_s0 = inlined_call_operand.vmem [shape: f32[2,8,32], index: 0, kind: input, shape index: {}]   ;;  %s2096_s1 = inlined_call_operand.vmem [shape: f32[1,32], index: 1, kind: input, shape index: {}]   ;;  %s2097_s2 = inlined_call_operand.vmem [shape: f32[16,32], index: 2, kind: input, shape index: {}]   ;;  %s2098_s3 = inlined_call_operand.vmem [shape: f32[16,32], index: 3, kind: input, shape index: {}]   ;;  %s2099_s4 = inlined_call_operand.vmem [shape: bf16[32,160], index: 4, kind: input, shape index: {}]   ;;  %s2100_s5 = inlined_call_operand.vmem [shape: f32[1,160], index: 5, kind: input, shape index: {}]   ;;  %s2101_s6 = inlined_call_operand.vmem [shape: bf16[32,32], index: 6, kind: input, shape index: {}]   ;;  %s2102_s7 = inlined_call_operand.vmem [shape: f32[1,32], index: 7, kind: input, shape index: {}]   ;;  %s2103_s8 = inlined_call_operand.vmem [shape: bf16[32,32], index: 8, kind: input, shape index: {}]   ;;  %s2104_s9 = inlined_call_operand.vmem [shape: f32[1,32], index: 9, kind: input, shape index: {}]   ;;  %s2105_s10 = inlined_call_operand.vmem [shape: bf16[32,64], index: 10, kind: input, shape index: {}]   ;;  %s2106_s11 = inlined_call_operand.vmem [shape: f32[1,64], index: 11, kind: input, shape index: {}]   ;;  %s2107_s12 = inlined_call_operand.vmem [shape: bf16[32,128], index: 12, kind: input, shape index: {}]   ;;  %s2108_s13 = inlined_call_operand.vmem [shape: f32[1,128], index: 13, kind: input, shape index: {}]   ;;  %s2109_s14 = inlined_call_operand.hbm [shape: f32[2,8,128], index: 14, kind: output, shape index: {}]  }
   0x1   :  { %2113 = sst [smem:[#allocation9_spill]] %s2095_s0 }
   0x2   :  { %19 = vsyncpa [#allocation4], 0 }
   0x3   :  { %21 = vsyncpa [#allocation4 + $0x1], 0  ;;  %s1822_s29 = smov 0   ;;  %s1824_s30 = smov 0  }
   0x4   :  { %s1826_s15 = smov 0   ;;  %s1828_s16 = smov 0  }
   0x5 LB: > { %2114 = sst [smem:[#allocation6_spill]] %s1725_s15  ;;  %s1843_s17 = sadd.s32 4294967295, %s1729_s16   ;;  %s1729_s16 = sphi %s1828_s16, %s2120_s16   ;;  %s1725_s15 = sphi %s1826_s15, %s2122_s15   ;;  %s1721_s30 = sphi %s1824_s30, %s2124_s30   ;;  %s1717_s29 = sphi %s1822_s29, %s2123_s29  }
   0x6   : > { %s1429_s18 = sadd.s32 4294967294, %s1729_s16   ;;  %s1847_s19 = sadd.s32 1, %s1729_s16  }
   0x7   : > { %2115 = sst [smem:[#allocation7_spill]] %s1847_s19  ;;  %s333_s20 = sadd.s32 1, %s1725_s15 }
   0x8   : > { %s330_s21 = ssub.s32 %s1729_s16, %s1847_s19  ;;  %p343_p0 = scmp.ne.s32.totalorder %s1725_s15, %s1721_s30 }
   0x9   : > { %p331_p1 = scmp.eq.s32.totalorder %s330_s21, 0  ;;  %p344_p2 = scmp.eq.s32.totalorder %s1843_s17, 1 }
   0xa   : > { %p349_p3 = scmp.ne.s32.totalorder %s1721_s30, %s1717_s29  ;;  %p350_p4 = scmp.eq.s32.totalorder %s1429_s18, 1 }
   0xb   : > { %s1858_s22 = scalar_select %p331_p1, %s1725_s15, %s333_s20  }
   0xc   : > { %p1860_p5 = por %p344_p2, %p343_p0  ;;  %p1864_p6 = por %p350_p4, %p349_p3 }
   0xd   : > { %2116 = sst [smem:[#allocation8_spill]] %s1858_s22  ;;  %p1432_p7 = scmp.ge.s32.totalorder %s1729_s16, 1 }
   0xe   : > { %p414_p8 = scmp.lt.s32.totalorder %s1729_s16, 3 }
  0x10   : > { %p415_p9 = pnand %p1432_p7, %p414_p8 }
  0x11   : > { %p459_p10 = scmp.lt.s32.totalorder (!%p415_p9), %s1843_s17, 1  ;;  %s2119_s0 = sld [smem:[#allocation9_spill]] (!%p415_p9) }
  0x12   : > { %418 = sbr.rel (%p415_p9) target bundleno = 2603 (0xa2b), region = 76  ;;  %s1732_s15 = smov (!%p415_p9), 32  }
  0x13   : > { %s1733_s19 = smov (!%p415_p9), 96   ;;  %s1734_s21 = smov (!%p415_p9), 64  }
  0x14   : > { %s1739_s22 = smov (!%p415_p9), 56   ;;  %s1740_s20 = smov (!%p415_p9), 120  }
  0x15   : > { %s1466_s27 = sshll.u32 (!%p415_p9), %s1843_s17, 7 }
  0x17   : > { %s460_s25 = scalar_select %p459_p10, %s1843_s17, 1  ;;  %vm467_vm0 = vcmask 261120   ;;  %v1631_v3 = vld [vmem:[%s2099_s4 + $0x14] ss:$8 sps:$4 sm:$0xff]   ;;  %v1633_v4 = vld [vmem:[%s2099_s4 + $0x10] ss:$8 sps:$4 sm:$0xff]   ;;  %v490_v19 = vlaneseq }
  0x18   : > { %v1634_v5 = vld [vmem:[%s2099_s4 + $0x4] ss:$8 sps:$4 sm:$0xff]   ;;  %535 = vmatprep.subr.bf16.mxu0 %v1631_v3  ;;  %v1731_v6 = vmov 0   ;;  %v1636_v7 = vld [vmem:[%s2099_s4] ss:$8 sps:$4 sm:$0xff]   ;;  %v1735_v18 = vmov 0.0  }
  0x19   : > { %s1434_s26 = sshll.u32 %s460_s25, 3  ;;  %555 = vmatprep.mubr.bf16.mxu0 %v1731_v6  ;;  %536 = vmatpush1.bf16.msra.mxu0 %v1633_v4  ;;  %v565_v8 = vld [vmem:[%s2098_s3] sm:$0xff]  ;;  %v1910_v20 = vshrl.u32 %v490_v19, 7  ;;  %vm665_vm1 = vcmask 1043456   ;;  %vm1736_vm2 = vmmov 0   ;;  %s1741_s25 = smov 112  }
  0x1a   : > { %s462_s18 = scalar_lea.vmem %s2119_s0, %s1434_s26  ;;  %537 = vmatprep.subr.bf16.mxu0 %v1634_v5  ;;  %568 = vrot.lane.b32.xlu1 %v565_v8, %s1732_s15  ;;  %v564_v9 = vld [vmem:[%s2097_s2] sm:$0xff]  ;;  %s1738_s15 = smov 40   ;;  %vm602_vm3 = vcmask 64512   ;;  %v597_v58 = vand.u32 127, %v490_v19  ;;  %vm827_vm5 = vcmask 130112   ;;  %vm944_vm6 = vcmask 195712  }
  0x1b   : > { %v464_v0 = vld [vmem:[%s462_s18] sm:$0xff]  ;;  %1497 = vmatprep.subr.bf16.mxu1 %v1735_v18  ;;  %v492_v21 = vsub.s32 0, %v1910_v20  ;;  %v496_v23 = vsub.s32 1, %v1910_v20  ;;  %1499 = vmatprep.mubr.msk.bf16.mxu1 %vm1736_vm2, %v1735_v18  ;;  %s1737_s18 = smov 48   ;;  %s1742_s26 = smov 104   ;;  %vm1061_vm7 = vcmask 261312  }
  0x1c   : > { %v466_v1 = vmul.f32 %v464_v0, %v464_v0  ;;  %v1899_v14 = vld [vmem:[%s2096_s1] ss:$0 sm:$0xff]  ;;  %vm598_vm4 = vcmp.le.s32.totalorder %v597_v58, %v1910_v20  ;;  %s1746_s17 = smov [#allocation3]  }
  0x1d   : > { %538 = vmatpush1.bf16.msra.mxu0 %v1636_v7  ;;  %v488_v22 = vld [vmem:[%s2100_s5] sm:$0x3] }
  0x1e   : > { %v468_v2 = vsel %vm467_vm0, %v466_v1, 0.0  ;;  %579 = vrot.lane.b32.xlu1 %v564_v9, %s1734_s21  ;;  %1503 = vmatprep.subr.bf16.mxu0 %v1735_v18  ;;  %v493_v24 = vrot.slane %v488_v22, %v492_v21  ;;  %v497_v25 = vrot.slane %v488_v22, %v496_v23 }
  0x1f   : > { %469 = vadd.xlane.f32.xlu0 %v468_v2 }
  0x35   : > { %583 = vrot.lane.b32.xlu0 %v565_v8, %s1733_s19 }
  0x8c   : > { %v569_v34 = vpop.permute.xlu1 %568 }
  0x90   : > { %v580_v38 = vpop.permute.xlu1 %579 }
  0xa8   : > { %v470_v10 = vpop.xlane.xlu0 %469 }
  0xa9   : > { %v472_v11 = vmul.f32 0.03125, %v470_v10 }
  0xab   : > { %v473_v12 = vadd.f32 1e-08, %v472_v11 }
  0xac   : > { %v584_v27 = vpop.permute.xlu0 %583 }
  0xad   : > { %1645 = vrsqrt.f32 %v473_v12 }
  0xba   : > { %v1646_v13 = vpop.eup %1645 }
  0xbb   : > { %v475_v15 = vmul.f32 %v1646_v13, %v464_v0 }
  0xbd   : > { %v1902_v16 = vmul.f32 %v1899_v14, %v475_v15 }
  0xbf   : > { %v483_v17 = vpack.c.bf16 %v1902_v16, %v1902_v16 }
  0xc1   : > { %1440 = vmatmul.mubr.msk.bf16.vlgmr.msra.gmra.mxu0 %vm467_vm0, %v483_v17 }
  0xc2   : > { %1505 = vmatprep.mubr.msk.bf16.mxu0 %vm1736_vm2, %v1735_v18 }
 0x181   : > { %v557_v26 = vpop.f32.mrf.mxu0 }
 0x182   : > { %v558_v28 = vadd.f32 %v557_v26, %v493_v24 }
 0x183   : > { %v559_v29 = vpop.f32.mrf.mxu0 }
 0x184   : > { %v560_v30 = vadd.f32 %v559_v29, %v497_v25  ;;  %v586_v31 = vmul.f32 %v584_v27, %v558_v28  ;;  %v571_v37 = vmul.f32 %v569_v34, %v558_v28  ;;  %v582_v39 = vmul.f32 %v580_v38, %v558_v28 }
 0x185   : > { %v561_v32 = vpop.f32.mrf.mxu0  ;;  %v566_v44 = vmul.f32 %v564_v9, %v558_v28 }
 0x186   : > { %v1917_v33 = vpack.c.bf16 %v560_v30, %v560_v30  ;;  %588 = vrot.lane.b32.xlu1 %v586_v31, %s1733_s19 }
 0x187   : > { %v562_v35 = vpop.f32.mrf.mxu0 }
 0x188   : > { %v667_v36 = vsel %vm665_vm1, %v1917_v33, 0 }
 0x189   : > { %1504 = vmatpush3.bf16.msra.mxu0 %v667_v36 }
 0x18a   : > { %573 = vrot.lane.b32.xlu1 %v571_v37, %s1733_s19  ;;  %1515 = vmatprep.subr.bf16.mxu0 %v1735_v18 }
 0x1f8   : > { %v589_v40 = vpop.permute.xlu1 %588 }
 0x1f9   : > { %v591_v41 = vadd.f32 %v589_v40, %v582_v39 }
 0x1fb   : > { %v592_v42 = vpack.c.bf16 %v591_v41, %v591_v41 }
 0x1fc   : > { %v574_v43 = vpop.permute.xlu1 %573 }
 0x1fd   : > { %831 = vrot.lane.b32.xlu0 %v592_v42, %s1737_s18  ;;  %600 = vrot.lane.b32.xlu1 %v592_v42, %s1734_s21  ;;  %v576_v45 = vadd.f32 %v574_v43, %v566_v44  ;;  %s1743_s21 = smov 8  }
 0x1ff   : > { %v577_v46 = vpack.c.bf16 %v576_v45, %v576_v45 }
 0x201   : > { %948 = vrot.lane.b32.xlu0 %v592_v42, %s1738_s15  ;;  %713 = vrot.lane.b32.xlu1 %v592_v42, %s1739_s22  ;;  %s1744_s22 = smov 16  }
 0x205   : > { %711 = vrot.lane.b32.xlu1 %v577_v46, %s1740_s20 }
 0x209   : > { %829 = vrot.lane.b32.xlu1 %v577_v46, %s1741_s25 }
 0x20d   : > { %946 = vrot.lane.b32.xlu1 %v577_v46, %s1742_s26 }
 0x26f   : > { %v601_v47 = vpop.permute.xlu1 %600  ;;  %v832_v51 = vpop.permute.xlu0 %831 }
 0x270   : > { %v607_v48 = vsel %vm602_vm3, %v601_v47, 0  ;;  %v837_v53 = vsel %vm602_vm3, %v832_v51, 0 }
 0x271   : > { %1498 = vmatpush3.bf16.xpose.msra.mxu1 %v607_v48 }
 0x272   : > { %1509 = vmatprep.subr.bf16.mxu1 %v1735_v18 }
 0x273   : > { %v714_v49 = vpop.permute.xlu1 %713  ;;  %v949_v54 = vpop.permute.xlu0 %948 }
 0x274   : > { %v719_v50 = vsel %vm602_vm3, %v714_v49, 0  ;;  %v954_v56 = vsel %vm602_vm3, %v949_v54, 0 }
 0x277   : > { %v712_v52 = vpop.permute.xlu1 %711 }
 0x278   : > { %1500 = vmatmul.mubr.msk.bf16.vlgmr.msra.gmra.mxu1 %vm602_vm3, %v577_v46 }
 0x279   : > { %1510 = vmatpush3.bf16.xpose.msra.mxu1 %v719_v50  ;;  %1511 = vmatprep.mubr.msk.bf16.mxu1 %vm1736_vm2, %v1735_v18 }
 0x27a   : > { %1521 = vmatprep.subr.bf16.mxu1 %v1735_v18 }
 0x27b   : > { %v830_v55 = vpop.permute.xlu1 %829 }
 0x27f   : > { %v947_v57 = vpop.permute.xlu1 %946 }
 0x280   : > { %1512 = vmatmul.mubr.msk.bf16.vlgmr.msra.gmra.mxu1 %vm602_vm3, %v712_v52 }
 0x281   : > { %1522 = vmatpush3.bf16.xpose.msra.mxu1 %v837_v53  ;;  %1523 = vmatprep.mubr.msk.bf16.mxu1 %vm1736_vm2, %v1735_v18 }
 0x282   : > { %1533 = vmatprep.subr.bf16.mxu1 %v1735_v18 }
 0x288   : > { %1524 = vmatmul.mubr.msk.bf16.vlgmr.msra.gmra.mxu1 %vm602_vm3, %v830_v55 }
 0x289   : > { %1534 = vmatpush3.bf16.xpose.msra.mxu1 %v954_v56  ;;  %1535 = vmatprep.mubr.msk.bf16.mxu1 %vm1736_vm2, %v1735_v18 }
 0x28a   : > { %1545 = vmatprep.subr.bf16.mxu1 %v1735_v18 }
 0x290   : > { %1536 = vmatmul.mubr.msk.bf16.vlgmr.msra.gmra.mxu1 %vm602_vm3, %v947_v57 }
 0x291   : > { %1549 = vmatprep.mubr.msk.bf16.mxu1 %vm1736_vm2, %v1735_v18 }
 0x338   : > { %v643_v59 = vpop.f32.mrf.mxu1 }
 0x339   : > { %v649_v60 = vsel %vm598_vm4, %v643_v59, -1e+30 }
 0x33a   : > { %v1501_v61 = vpop.f32.mrf.mxu1  ;;  %v650_v62 = vsel %vm602_vm3, %v649_v60, -inf }
 0x33b   : > { %651 = vmax.xlane.f32.xlu0 %v650_v62 }
 0x33c   : > { %v646_v63 = vpop.f32.mrf.mxu1 }
 0x33e   : > { %v1502_v0 = vpop.f32.mrf.mxu1 }
 0x340   : > { %v755_v1 = vpop.f32.mrf.mxu1 }
 0x341   : > { %v761_v2 = vsel %vm598_vm4, %v755_v1, -1e+30 }
 0x342   : > { %v1513_v3 = vpop.f32.mrf.mxu1  ;;  %v762_v4 = vsel %vm602_vm3, %v761_v2, -inf }
 0x343   : > { %763 = vmax.xlane.f32.xlu1 %v762_v4 }
 0x344   : > { %v758_v5 = vpop.f32.mrf.mxu1 }
 0x346   : > { %v1514_v6 = vpop.f32.mrf.mxu1 }
 0x348   : > { %v873_v7 = vpop.f32.mrf.mxu1 }
 0x349   : > { %v879_v8 = vsel %vm598_vm4, %v873_v7, -1e+30 }
 0x34a   : > { %v1525_v9 = vpop.f32.mrf.mxu1  ;;  %v880_v10 = vsel %vm602_vm3, %v879_v8, -inf }
 0x34b   : > { %881 = vmax.xlane.f32.xlu0 %v880_v10  ;;  %v1638_v9 = vld [vmem:[%s2101_s6] sm:$0xff]  }
 0x34c   : > { %v876_v11 = vpop.f32.mrf.mxu1 }
 0x34e   : > { %v1526_v12 = vpop.f32.mrf.mxu1 }
 0x350   : > { %v990_v13 = vpop.f32.mrf.mxu1 }
 0x351   : > { %v996_v15 = vsel %vm598_vm4, %v990_v13, -1e+30 }
 0x352   : > { %v1537_v17 = vpop.f32.mrf.mxu1  ;;  %v997_v19 = vsel %vm602_vm3, %v996_v15, -inf }
 0x353   : > { %998 = vmax.xlane.f32.xlu0 %v997_v19 }
 0x354   : > { %v993_v21 = vpop.f32.mrf.mxu1 }
 0x356   : > { %v1538_v22 = vpop.f32.mrf.mxu1 }
 0x3c4   : > { %v652_v23 = vpop.xlane.xlu0 %651 }
 0x3c5   : > { %v653_v24 = vsub.f32 %v649_v60, %v652_v23 }
 0x3c7   : > { %v654_v25 = vmul.f32 1.442695, %v653_v24 }
 0x3c9   : > { %1647 = vpow2.f32 %v654_v25 }
 0x3cc   : > { %v764_v26 = vpop.xlane.xlu1 %763 }
 0x3cd   : > { %v765_v27 = vsub.f32 %v761_v2, %v764_v26 }
 0x3cf   : > { %v766_v28 = vmul.f32 1.442695, %v765_v27  ;;  %v1449_v27 = vld [vmem:[%s2102_s7] ss:$0 sm:$0xff] }
 0x3d1   : > { %1649 = vpow2.f32 %v766_v28 }
 0x3d4   : > { %v882_v31 = vpop.xlane.xlu0 %881 }
 0x3d5   : > { %v883_v39 = vsub.f32 %v879_v8, %v882_v31  ;;  %v1637_v8 = vld [vmem:[%s2101_s6 + $0x8] sm:$0xff]  }
 0x3d6   : > { %v1648_v29 = vpop.eup %1647  ;;  %1546 = vmatpush3.bf16.msra.mxu1 %v1637_v8 }
 0x3d7   : > { %v656_v30 = vsel %vm602_vm3, %v1648_v29, 0.0  ;;  %v884_v40 = vmul.f32 1.442695, %v883_v39  ;;  %1547 = vmatprep.subr.bf16.mxu1 %v1735_v18 }
 0x3d8   : > { %657 = vadd.xlane.f32.xlu1 %v656_v30 }
 0x3da   : > { %1548 = vmatpush3.bf16.msra.mxu1 %v1638_v9 }
 0x3db   : > { %1561 = vmatprep.subr.bf16.mxu1 %v1735_v18 }
 0x3dc   : > { %v999_v20 = vpop.xlane.xlu0 %998 }
 0x3dd   : > { %v1000_v32 = vsub.f32 %v996_v15, %v999_v20 }
 0x3de   : > { %v1650_v34 = vpop.eup %1649 }
 0x3df   : > { %v1001_v35 = vmul.f32 1.442695, %v1000_v32  ;;  %v768_v36 = vsel %vm602_vm3, %v1650_v34, 0.0 }
 0x3e0   : > { %769 = vadd.xlane.f32.xlu0 %v768_v36  ;;  %v1639_v36 = vld [vmem:[%s2103_s8 + $0x8] sm:$0xff]  }
 0x3e1   : > { %1651 = vpow2.f32 %v1001_v35 }
 0x3e2   : > { %1653 = vpow2.f32 %v884_v40 }
 0x3e9   : > { %775 = vrot.lane.b32.xlu1 %v1917_v33, %s1740_s20  ;;  %s1745_s20 = smov 24  }
 0x3ee   : > { %v1652_v37 = vpop.eup %1651 }
 0x3ef   : > { %v1003_v38 = vsel %vm602_vm3, %v1652_v37, 0.0  ;;  %v1654_v41 = vpop.eup %1653 }
 0x3f0   : > { %1004 = vadd.xlane.f32.xlu0 %v1003_v38  ;;  %v886_v42 = vsel %vm602_vm3, %v1654_v41, 0.0 }
 0x406   : > { %892 = vrot.lane.b32.xlu0 %v1917_v33, %s1741_s25  ;;  %s456_s25 = sand.u32 1, %s1721_s30  }
 0x40d   : > { %887 = vadd.xlane.f32.xlu1 %v886_v42 }
 0x41e   : > { %1009 = vrot.lane.b32.xlu1 %v1917_v33, %s1742_s26  ;;  %s1357_s26 = scalar_lea.sflag [#allocation4], %s456_s25 }
 0x461   : > { %v658_v43 = vpop.xlane.xlu1 %657 }
 0x462   : > { %1655 = vrcp.f32 %v658_v43 }
 0x465   : > { %v776_v47 = vpop.permute.xlu1 %775 }
 0x466   : > { %v781_v49 = vsel %vm665_vm1, %v776_v47, 0 }
 0x469   : > { %v770_v44 = vpop.xlane.xlu0 %769 }
 0x46a   : > { %1657 = vrcp.f32 %v770_v44 }
 0x46f   : > { %v1656_v45 = vpop.eup %1655 }
 0x470   : > { %v660_v46 = vmul.f32 %v1656_v45, %v1648_v29  ;;  %v1642_v45 = vld [vmem:[%s2105_s10] sm:$0xff]  }
 0x472   : > { %v661_v48 = vpack.c.bf16 %v660_v46, %v660_v46  ;;  %v1453_v46 = vld [vmem:[%s2104_s9] ss:$0 sm:$0xff] }
 0x474   : > { %1506 = vmatmul.mubr.msk.bf16.vlgmr.msra.gmra.mxu0 %vm602_vm3, %v661_v48 }
 0x475   : > { %1516 = vmatpush3.bf16.msra.mxu0 %v781_v49  ;;  %1517 = vmatprep.mubr.msk.bf16.mxu0 %vm1736_vm2, %v1735_v18 }
 0x476   : > { %1527 = vmatprep.subr.bf16.mxu0 %v1735_v18 }
 0x477   : > { %v1658_v50 = vpop.eup %1657 }
 0x478   : > { %v772_v33 = vmul.f32 %v1658_v50, %v1650_v34 }
 0x479   : > { %v1005_v51 = vpop.xlane.xlu0 %1004 }
 0x47a   : > { %v773_v52 = vpack.c.bf16 %v772_v33, %v772_v33 }
 0x47c   : > { %1518 = vmatmul.mubr.msk.bf16.vlgmr.msra.gmra.mxu0 %vm602_vm3, %v773_v52  ;;  %v1644_v52 = vld [vmem:[%s2107_s12] sm:$0xff]  }
 0x47d   : > { %v893_v53 = vpop.permute.xlu0 %892  ;;  %1529 = vmatprep.mubr.msk.bf16.mxu0 %vm1736_vm2, %v1735_v18 }
 0x47e   : > { %v898_v54 = vsel %vm665_vm1, %v893_v53, 0  ;;  %v1457_v53 = vld [vmem:[%s2106_s11] ss:$0 sm:$0xff] }
 0x47f   : > { %1528 = vmatpush3.bf16.msra.mxu0 %v898_v54 }
 0x480   : > { %1539 = vmatprep.subr.bf16.mxu0 %v1735_v18 }
 0x496   : > { %v888_v55 = vpop.xlane.xlu1 %887 }
 0x497   : > { %1659 = vrcp.f32 %v888_v55 }
 0x498   : > { %1661 = vrcp.f32 %v1005_v51  ;;  %v1643_v51 = vld [vmem:[%s2107_s12 + $0x8] sm:$0xff]  }
 0x49a   : > { %v1010_v58 = vpop.permute.xlu1 %1009 }
 0x49b   : > { %v1015_v61 = vsel %vm665_vm1, %v1010_v58, 0 }
 0x4a4   : > { %v1660_v56 = vpop.eup %1659 }
 0x4a5   : > { %v890_v57 = vmul.f32 %v1660_v56, %v1654_v41  ;;  %v1662_v60 = vpop.eup %1661 }
 0x4a6   : > { %v1007_v62 = vmul.f32 %v1662_v60, %v1652_v37  ;;  %v1640_v37 = vld [vmem:[%s2103_s8] sm:$0xff]  }
 0x4a7   : > { %v891_v59 = vpack.c.bf16 %v890_v57, %v890_v57 }
 0x4a8   : > { %v1008_v63 = vpack.c.bf16 %v1007_v62, %v1007_v62 }
 0x4a9   : > { %1530 = vmatmul.mubr.msk.bf16.vlgmr.msra.gmra.mxu0 %vm602_vm3, %v891_v59 }
 0x4aa   : > { %1540 = vmatpush3.bf16.msra.mxu0 %v1015_v61  ;;  %1541 = vmatprep.mubr.msk.bf16.mxu0 %vm1736_vm2, %v1735_v18 }
 0x4ab   : > { %1553 = vmatprep.subr.bf16.mxu0 %v1735_v18 }
 0x4b1   : > { %1542 = vmatmul.mubr.msk.bf16.vlgmr.msra.gmra.mxu0 %vm602_vm3, %v1008_v63 }
 0x4b2   : > { %1557 = vmatprep.mubr.msk.bf16.mxu0 %vm1736_vm2, %v1735_v18  ;;  %1554 = vmatpush3.bf16.msra.mxu0 %v1639_v36 }
 0x4b3   : > { %1555 = vmatprep.subr.bf16.mxu0 %v1735_v18 }
 0x4b6   : > { %1556 = vmatpush3.bf16.msra.mxu0 %v1640_v37 }
 0x4b7   : > { %1569 = vmatprep.subr.bf16.mxu0 %v1735_v18 }
 0x534   : > { %v703_v0 = vpop.f32.mrf.mxu0 }
 0x535   : > { %709 = vst.msk [vmem:[#allocation2] sm:$0xff] %vm602_vm3, %v703_v0 }
 0x536   : > { %v1507_v1 = vpop.f32.mrf.mxu0 }
 0x538   : > { %v706_v2 = vpop.f32.mrf.mxu0 }
 0x53a   : > { %v1508_v3 = vpop.f32.mrf.mxu0 }
 0x53c   : > { %v817_v4 = vpop.f32.mrf.mxu0 }
 0x53d   : > { %824 = vrot.lane.b32.xlu1 %v817_v4, %s1743_s21  ;;  %v1461_v4 = vld [vmem:[%s2108_s13] ss:$0 sm:$0xff] }
 0x53e   : > { %v1519_v5 = vpop.f32.mrf.mxu0 }
 0x540   : > { %v820_v6 = vpop.f32.mrf.mxu0 }
 0x542   : > { %v1520_v7 = vpop.f32.mrf.mxu0 }
 0x569   : > { %v934_v10 = vpop.f32.mrf.mxu0 }
 0x56a   : > { %941 = vrot.lane.b32.xlu0 %v934_v10, %s1744_s22 }
 0x56b   : > { %v1531_v11 = vpop.f32.mrf.mxu0 }
 0x56d   : > { %v937_v12 = vpop.f32.mrf.mxu0 }
 0x56f   : > { %v1532_v13 = vpop.f32.mrf.mxu0 }
 0x571   : > { %v1051_v15 = vpop.f32.mrf.mxu0 }
 0x572   : > { %1058 = vrot.lane.b32.xlu1 %v1051_v15, %s1745_s20  ;;  %s2054_s20 = scalar_lea.hbm %s2109_s14, %s1466_s27 }
 0x573   : > { %v1543_v17 = vpop.f32.mrf.mxu0 }
 0x575   : > { %v1054_v19 = vpop.f32.mrf.mxu0 }
 0x577   : > { %v1544_v21 = vpop.f32.mrf.mxu0 }
 0x5af   : > { %v825_v22 = vpop.permute.xlu1 %824 }
 0x5b0   : > { %828 = vst.msk [vmem:[#allocation2] sm:$0xff] %vm827_vm5, %v825_v22 }
 0x5dc   : > { %v942_v23 = vpop.permute.xlu0 %941 }
 0x5dd   : > { %945 = vst.msk [vmem:[#allocation2] sm:$0xff] %vm944_vm6, %v942_v23 }
 0x5e4   : > { %v1059_v24 = vpop.permute.xlu1 %1058 }
 0x5e5   : > { %1062 = vst.msk [vmem:[#allocation2] sm:$0xff] %vm1061_vm7, %v1059_v24 }
 0x5ec   : > { %v1063_v25 = vld [vmem:[#allocation2] sm:$0xff] }
 0x5ed   : > { %v1064_v26 = vpack.c.bf16 %v1063_v25, %v1063_v25 }
 0x5ef   : > { %1550 = vmatmul.mubr.msk.bf16.vlgmr.msra.gmra.mxu1 %vm467_vm0, %v1064_v26 }
 0x5f0   : > { %1565 = vmatprep.mubr.msk.bf16.mxu1 %vm1736_vm2, %v1735_v18 }
 0x6af   : > { %v1125_v28 = vpop.f32.mrf.mxu1 }
 0x6b0   : > { %v1126_v29 = vadd.f32 %v1449_v27, %v1125_v28 }
 0x6b1   : > { %v1551_v30 = vpop.f32.mrf.mxu1 }
 0x6b2   : > { %v1131_v31 = vadd.f32 %v1126_v29, %v1902_v16  ;;  %v1641_v16 = vld [vmem:[%s2105_s10 + $0x8] sm:$0xff]  }
 0x6b3   : > { %v1128_v20 = vpop.f32.mrf.mxu1  ;;  %1562 = vmatpush3.bf16.msra.mxu1 %v1641_v16 }
 0x6b4   : > { %v1132_v32 = vmul.f32 %v1131_v31, %v1131_v31  ;;  %1563 = vmatprep.subr.bf16.mxu1 %v1735_v18 }
 0x6b5   : > { %v1552_v34 = vpop.f32.mrf.mxu1 }
 0x6b6   : > { %v1133_v35 = vsel %vm467_vm0, %v1132_v32, 0.0 }
 0x6b7   : > { %1134 = vadd.xlane.f32.xlu0 %v1133_v35  ;;  %1564 = vmatpush3.bf16.msra.mxu1 %v1642_v45 }
 0x740   : > { %v1135_v38 = vpop.xlane.xlu0 %1134 }
 0x741   : > { %v1136_v39 = vmul.f32 0.03125, %v1135_v38 }
 0x743   : > { %v1137_v40 = vadd.f32 1e-08, %v1136_v39 }
 0x745   : > { %1663 = vrsqrt.f32 %v1137_v40 }
 0x752   : > { %v1664_v41 = vpop.eup %1663 }
 0x753   : > { %v1139_v42 = vmul.f32 %v1664_v41, %v1131_v31 }
 0x755   : > { %v1140_v43 = vmul.f32 %v1899_v14, %v1139_v42 }
 0x757   : > { %v1141_v44 = vpack.c.bf16 %v1140_v43, %v1140_v43 }
 0x759   : > { %1558 = vmatmul.mubr.msk.bf16.vlgmr.msra.gmra.mxu0 %vm467_vm0, %v1141_v44 }
 0x75a   : > { %1573 = vmatprep.mubr.msk.bf16.mxu0 %vm1736_vm2, %v1735_v18  ;;  %1570 = vmatpush3.bf16.msra.mxu0 %v1643_v51 }
 0x75b   : > { %1571 = vmatprep.subr.bf16.mxu0 %v1735_v18 }
 0x75e   : > { %1572 = vmatpush3.bf16.msra.mxu0 %v1644_v52 }
 0x819   : > { %v1202_v47 = vpop.f32.mrf.mxu0 }
 0x81a   : > { %v1203_v48 = vadd.f32 %v1453_v46, %v1202_v47 }
 0x81b   : > { %v1559_v49 = vpop.f32.mrf.mxu0 }
 0x81c   : > { %v1208_v50 = vpack.c.bf16 %v1203_v48, %v1203_v48 }
 0x81d   : > { %v1205_v14 = vpop.f32.mrf.mxu0 }
 0x81e   : > { %1566 = vmatmul.mubr.msk.bf16.vlgmr.msra.gmra.mxu1 %vm467_vm0, %v1208_v50 }
 0x81f   : > { %v1560_v33 = vpop.f32.mrf.mxu0 }
 0x8de   : > { %v1269_v54 = vpop.f32.mrf.mxu1 }
 0x8df   : > { %v1270_v55 = vadd.f32 %v1457_v53, %v1269_v54 }
 0x8e0   : > { %v1567_v56 = vpop.f32.mrf.mxu1 }
 0x8e1   : > { %1283 = vrot.lane.b32.xlu1 %v1270_v55, %s1733_s19  ;;  %v1275_v59 = vsub.f32 0.0, %v1270_v55  ;;  %s1433_s19 = sshll.u32 %s456_s25, 3 }
 0x8e2   : > { %v1272_v57 = vpop.f32.mrf.mxu1  ;;  %s458_s28 = scalar_lea.vmem [#allocation3], %s1433_s19  ;;  %s1673_s19 = sshll.u32 %s1746_s17, 4  ;;  %s1674_s19 = int_to_ptr.vmem [resolvable:$false] %s1673_s19 }
 0x8e3   : > { %v1276_v18 = vmul.f32 1.442695, %v1275_v59  ;;  %s1370_s18 = sshll.u32 %s458_s28, 4  ;;  %s1675_s15 = scalar_lea.vmem %s1674_s19, 256  ;;  %s2056_s18 = int_to_ptr.vmem [resolvable:$true] %s1370_s18 }
 0x8e4   : > { %v1568_v58 = vpop.f32.mrf.mxu1  ;;  %s1669_s21 = scalar_lea.vmem %s2056_s18, 128  ;;  %p1676_p0 = scmp.lt.s32.totalorder %s2056_s18, %s1674_s19 }
 0x8e5   : > { %1665 = vpow2.f32 %v1276_v18  ;;  %p1670_p11 = scmp.ne.s32.totalorder %s2056_s18, %s1669_s21  ;;  %p1677_p1 = scmp.lt.s32.totalorder %s1675_s15, %s1669_s21 }
 0x8e7   : > { %p1671_p12 = pnand %p1670_p11, %p1860_p5  ;;  %p1678_p2 = por %p1677_p1, %p1676_p0 }
 0x8e9   : > { %p1672_p13 = pneg %p1671_p12 }
 0x8eb   : > { %p1679_p3 = pnand %p1678_p2, %p1672_p13 }
 0x8f2   : > { %v1666_v60 = vpop.eup %1665 }
 0x8f3   : > { %v1278_v61 = vadd.f32 1.0, %v1666_v60 }
 0x8f5   : > { %1667 = vrcp.f32 %v1278_v61 }
 0x902   : > { %v1668_v62 = vpop.eup %1667 }
 0x903   : > { %v1281_v63 = vmul.f32 %v1668_v62, %v1270_v55 }
 0x953   : > { %v1284_v0 = vpop.permute.xlu1 %1283 }
 0x954   : > { %v1286_v1 = vmul.f32 %v1284_v0, %v1281_v63 }
 0x956   : > { %v1287_v2 = vadd.f32 %v1286_v1, %v1140_v43 }
 0x958   : > { %v1288_v3 = vpack.c.bf16 %v1287_v2, %v1287_v2 }
 0x95a   : > { %1574 = vmatmul.mubr.msk.bf16.vlgmr.msra.gmra.mxu0 %vm467_vm0, %v1288_v3 }
 0xa1a   : > { %v1349_v5 = vpop.f32.mrf.mxu0 }
 0xa1b   : > { %v1350_v6 = vadd.f32 %v1461_v4, %v1349_v5 }
 0xa1c   : > { %v1575_v7 = vpop.f32.mrf.mxu0 }
 0xa1d   : > { %1355 = vst [vmem:[%s458_s28] sm:$0xff] %v1350_v6 }
 0xa1e   : > { %v1352_v8 = vpop.f32.mrf.mxu0 }
 0xa1f   : > { %1682 = shalt.err (!%p1679_p3)
}
 0xa20   : > { %s1683_s27 = scalar_lea.hbm %s2054_s20, 128  ;;  %s1687_s22 = scalar_lea.hbm %s2109_s14, 256 }
 0xa21   : > { %p1684_p4 = scmp.ne.s32.totalorder %s2054_s20, %s1683_s27  ;;  %p1688_p9 = scmp.lt.s32.totalorder %s2054_s20, %s2109_s14 }
 0xa22   : > { %p1689_p10 = scmp.lt.s32.totalorder %s1687_s22, %s1683_s27 }
 0xa23   : > { %p1685_p7 = pnand %p1684_p4, %p1860_p5 }
 0xa24   : > { %p1690_p11 = por %p1689_p10, %p1688_p9 }
 0xa25   : > { %p1686_p8 = pneg %p1685_p7 }
 0xa27   : > { %p1691_p12 = pnand %p1690_p11, %p1686_p8 }
 0xa29   : > { %1694 = shalt.err (!%p1691_p12)
}
 0xa2a   : > { %1577 = dma.vmem_to_hbm [thread:$0]  (%p1860_p5), %s2056_s18, 128, %s2054_s20, %s1357_s26   ;;  %v1576_v9 = vpop.f32.mrf.mxu0 }
 0xa2b PF: > { %p1583_p13 = scmp.ge.s32.totalorder %s1729_s16, 2  ;;  %s1382_s21 = sand.u32 1, %s1717_s29  }
 0xa2c   : > { %s1383_s0 = scalar_lea.sflag [#allocation4], %s1382_s21 }
 0xa2d   : > { %p1580_p0 = pnand %p1583_p13, %p1864_p6 }
 0xa2f   : > { %p1581_p1 = pneg %p1580_p0 }
 0xa31   : > { %1712 = dma.done.wait (%p1581_p1), %s1383_s0, 128  }
 0xa32   : > { %1714 = vsyncadd (%p1581_p1), %s1383_s0, 4294967168  ;;  %s2120_s16 = sld [smem:[#allocation7_spill]]  ;;  %s2123_s29 = smov %s1721_s30 }
 0xa33   : > { %s2121_s19 = sld [smem:[#allocation6_spill]] }
 0xa34   : > { %s2122_s15 = sld [smem:[#allocation8_spill]] }
 0xa38   : > { %p24_p2 = scmp.ge.s32.totalorder %s2120_s16, 4  }
 0xa39   : > { %s2124_s30 = smov %s2121_s19 }
 0xa3a   :  { %26 = sbr.rel (!%p24_p2) target bundleno = 5 (0x5), region = 111 }
 0xa3f   :  { %1388 = vsyncpa [#allocation4], 1 }
 0xa40   :  { %1390 = vsyncpa [#allocation4 + $0x1], 1 }

</bundles_post_ra>
